<compile_context>
chip_gen: v7x
topology: tpu7x:2x2x1
jax: 0.10.0
libtpu: 0.0.40
codegen_flags: <defaults>
</compile_context>

<pallas_src>
import functools

import jax
import jax.numpy as jnp
from jax import lax
from jax.experimental import pallas as pl
from jax.experimental.pallas import tpu as pltpu

BN_EPS = 1e-5
NEG_SLOPE = 0.2


def _leaky_relu(x):
    return jnp.where(x > 0, x, NEG_SLOPE * x)


def _sigmoid(x):
    # exact sigmoid via tanh (EUP path, numerically stable for large |x|)
    return 0.5 * (jnp.tanh(0.5 * x) + 1.0)


def _round_up(a, b):
    return (a + b - 1) // b * b


def _mask_padded_rows(a, tile, n_valid):
    rows = pl.program_id(0) * tile + lax.broadcasted_iota(jnp.int32, (tile, 1), 0)
    return jnp.where(rows < n_valid, a, 0.0)


# --------------------------- kernels ---------------------------------------


def _first_stage_kernel(x_ref, w1_ref, w2_ref, h_ref, sum_ref, ssq_ref):
    """leaky(x @ W1) @ W2 per batch tile + per-tile sum/sumsq of the BN2 input."""
    h1 = jnp.dot(x_ref[...], w1_ref[...], preferred_element_type=jnp.float32)
    a1 = _leaky_relu(h1)
    # padded rows of x are zero -> a1 and h2 are zero there; no masking needed.
    h2 = jnp.dot(a1.astype(jnp.bfloat16), w2_ref[...],
                 preferred_element_type=jnp.float32)
    h_ref[...] = h2.astype(h_ref.dtype)                      # bf16 storage
    sum_ref[...] = jnp.sum(h2, axis=0, keepdims=True)        # f32 partial stats
    ssq_ref[...] = jnp.sum(h2 * h2, axis=0, keepdims=True)


def _mid_stage_kernel(h_ref, scale_ref, shift_ref, w_ref, o_ref, sum_ref, ssq_ref,
                      *, tile, n_valid, n_pad):
    """leaky(BN(h)) @ W per batch tile + per-tile sum/sumsq of the next BN input."""
    # fused BatchNorm (global scale/shift precomputed in the wrapper) + LeakyReLU, f32
    h = h_ref[...].astype(jnp.float32)
    a = _leaky_relu(h * scale_ref[...] + shift_ref[...])
    if n_pad != n_valid:
        # padded rows would otherwise pollute the next layer's batch statistics
        a = _mask_padded_rows(a, tile, n_valid)
    y = jnp.dot(a.astype(jnp.bfloat16), w_ref[...],
                preferred_element_type=jnp.float32)
    o_ref[...] = y.astype(o_ref.dtype)                       # bf16 storage
    sum_ref[...] = jnp.sum(y, axis=0, keepdims=True)          # f32 partial stats
    ssq_ref[...] = jnp.sum(y * y, axis=0, keepdims=True)


def _last_stage_kernel(h_ref, scale_ref, shift_ref, w5t_ref, o_ref):
    """sigmoid(leaky(BN(h)) @ w5) written as a lane-dense [1, tile] row."""
    h = h_ref[...].astype(jnp.float32)
    a = _leaky_relu(h * scale_ref[...] + shift_ref[...])
    # w5^T [1,F] contracted with a [tile,F] over F -> [1, tile] (lane-dense output
    # row instead of a [tile, 1] column of masked partial stores).
    logits = lax.dot_general(
        w5t_ref[...], a.astype(jnp.bfloat16),
        dimension_numbers=(((1,), (1,)), ((), ())),
        preferred_element_type=jnp.float32)
    o_ref[...] = _sigmoid(logits)


# --------------------------- wrapper ----------------------------------------


def _bn_fold(s, ssq, gamma, beta, n):
    """Fold training-mode BN (biased variance, eps=1e-5) into one scale/shift."""
    mean = s / n
    var = jnp.maximum(ssq / n - mean * mean, 0.0)   # clamp f32 cancellation
    scale = lax.rsqrt(var + BN_EPS) * gamma
    shift = beta - mean * scale
    return scale, shift


def _default_tiling():
    """(tile_rows, vmem_limit_bytes) picked from the TPU generation's VMEM size."""
    try:
        vmem_bytes = int(pltpu.get_tpu_info().vmem_capacity_bytes)
    except Exception:
        vmem_bytes = 64 * 1024 * 1024
    if vmem_bytes >= 100 * 1024 * 1024:        # v5e / v6e: 128 MiB physical VMEM
        return 1024, 64 * 1024 * 1024
    return 512, 32 * 1024 * 1024               # v7x: 64 MiB physical VMEM


def netd_forward(x, params, *, tile_n=None):
    """x: [N, nc] float32; params as produced by init_params. Returns [N, 1]."""
    (w1, w2, g2, b2, w3, g3, b3, w4, g4, b4, w5) = params
    n, nc = x.shape
    f1, f2, f3, f4 = w1.shape[1], w2.shape[1], w3.shape[1], w4.shape[1]

    default_tile, vmem_limit = _default_tiling()
    if tile_n is None:
        tile_n = default_tile

    # rows per grid step: multiple of 16 so bf16 sublane pairs are never split
    tile = _round_up(min(tile_n, _round_up(n, 16)), 16)
    n_pad = _round_up(n, tile)
    grid_n = n_pad // tile
    grid = (grid_n,)

    # bf16 MXU feeds: pre-cast x and weights once; BN/activation math stays f32.
    x = x.astype(jnp.bfloat16)
    if n_pad != n:
        x = jnp.pad(x, ((0, n_pad - n), (0, 0)))
    w1b, w2b, w3b, w4b = (w.astype(jnp.bfloat16) for w in (w1, w2, w3, w4))
    w5t = jnp.transpose(w5).astype(jnp.bfloat16)              # [1, 8*ndf]

    # every stage writes disjoint blocks per grid step -> batch axis is parallel
    # (megacore-sharded on v7x); BN stats are reduced across tiles in plain JAX.
    cparams = pltpu.CompilerParams(
        dimension_semantics=("parallel",),
        vmem_limit_bytes=vmem_limit)

    def row_spec(f):                              # batch-tiled activation blocks
        return pl.BlockSpec((tile, f), lambda i: (i, 0))

    def const_spec(shape):                        # VMEM-resident weights / BN params
        return pl.BlockSpec(shape, lambda i: (0, 0))

    def stat_spec(f):                             # per-tile partial BN statistics
        return pl.BlockSpec((1, f), lambda i: (i, 0))

    def stat_shapes(f):
        return (jax.ShapeDtypeStruct((grid_n, f), jnp.float32),
                jax.ShapeDtypeStruct((grid_n, f), jnp.float32))

    # ---- stage 1: Linear1 + LeakyReLU + Linear2, per-tile BN2 stats ----
    h2, s2t, q2t = pl.pallas_call(
        _first_stage_kernel,
        grid=grid,
        in_specs=[row_spec(nc), const_spec((nc, f1)), const_spec((f1, f2))],
        out_specs=(row_spec(f2), stat_spec(f2), stat_spec(f2)),
        out_shape=(jax.ShapeDtypeStruct((n_pad, f2), jnp.bfloat16),) + stat_shapes(f2),
        compiler_params=cparams,
    )(x, w1b, w2b)
    sc2, sh2 = _bn_fold(s2t.sum(0, keepdims=True), q2t.sum(0, keepdims=True),
                        g2, b2, n)

    mid = functools.partial(_mid_stage_kernel, tile=tile, n_valid=n, n_pad=n_pad)

    # ---- stage 2: BN2 + LeakyReLU + Linear3, per-tile BN3 stats ----
    h3, s3t, q3t = pl.pallas_call(
        mid,
        grid=grid,
        in_specs=[row_spec(f2), const_spec((1, f2)), const_spec((1, f2)),
                  const_spec((f2, f3))],
        out_specs=(row_spec(f3), stat_spec(f3), stat_spec(f3)),
        out_shape=(jax.ShapeDtypeStruct((n_pad, f3), jnp.bfloat16),) + stat_shapes(f3),
        compiler_params=cparams,
    )(h2, sc2, sh2, w3b)
    sc3, sh3 = _bn_fold(s3t.sum(0, keepdims=True), q3t.sum(0, keepdims=True),
                        g3, b3, n)

    # ---- stage 3: BN3 + LeakyReLU + Linear4, per-tile BN4 stats ----
    # TODO(synk): on v5e one could skip writing h4 here and recompute it in
    # stage 4 from h3 (trades one matmul for the largest HBM stream).
    h4, s4t, q4t = pl.pallas_call(
        mid,
        grid=grid,
        in_specs=[row_spec(f3), const_spec((1, f3)), const_spec((1, f3)),
                  const_spec((f3, f4))],
        out_specs=(row_spec(f4), stat_spec(f4), stat_spec(f4)),
        out_shape=(jax.ShapeDtypeStruct((n_pad, f4), jnp.bfloat16),) + stat_shapes(f4),
        compiler_params=cparams,
    )(h3, sc3, sh3, w4b)
    sc4, sh4 = _bn_fold(s4t.sum(0, keepdims=True), q4t.sum(0, keepdims=True),
                        g4, b4, n)

    # ---- stage 4: BN4 + LeakyReLU + Linear5 + Sigmoid (lane-dense output) ----
    out_rows = pl.pallas_call(
        _last_stage_kernel,
        grid=grid,
        in_specs=[row_spec(f4), const_spec((1, f4)), const_spec((1, f4)),
                  const_spec((1, f4))],
        out_specs=pl.BlockSpec((1, tile), lambda i: (i, 0)),
        out_shape=jax.ShapeDtypeStruct((grid_n, tile), jnp.float32),
        compiler_params=cparams,
    )(h4, sc4, sh4, w5t)

    return out_rows.reshape(n_pad, 1)[:n]


# --------------------------- params & references ----------------------------


def init_params(key, nc, ndf):
    k1, k2, k3, k4, k5 = jax.random.split(key, 5)

    def lin(k, fin, fout):
        return (jax.random.normal(k, (fin, fout), jnp.float32)
                * (1.0 / jnp.sqrt(jnp.float32(fin))))

    w1 = lin(k1, nc, ndf)
    w2 = lin(k2, ndf, ndf * 2)
    w3 = lin(k3, ndf * 2, ndf * 4)
    w4 = lin(k4, ndf * 4, ndf * 8)
    w5 = lin(k5, ndf * 8, 1)
    # BatchNorm affine params at PyTorch defaults (weight=1, bias=0), kept [1, F].
    g2, b2 = jnp.ones((1, ndf * 2), jnp.float32), jnp.zeros((1, ndf * 2), jnp.float32)
    g3, b3 = jnp.ones((1, ndf * 4), jnp.float32), jnp.zeros((1, ndf * 4), jnp.float32)
    g4, b4 = jnp.ones((1, ndf * 8), jnp.float32), jnp.zeros((1, ndf * 8), jnp.float32)
    return (w1, w2, g2, b2, w3, g3, b3, w4, g4, b4, w5)


def netd_reference_f32(x, params):
    """Pure-f32 reference matching the PyTorch module (training-mode BN)."""
    (w1, w2, g2, b2, w3, g3, b3, w4, g4, b4, w5) = params

    def bn(h, g, b):
        mean = jnp.mean(h, axis=0, keepdims=True)
        var = jnp.mean((h - mean) ** 2, axis=0, keepdims=True)
        return (h - mean) * lax.rsqrt(var + BN_EPS) * g + b

    h = _leaky_relu(x @ w1)
    h = _leaky_relu(bn(h @ w2, g2, b2))
    h = _leaky_relu(bn(h @ w3, g3, b3))
    h = _leaky_relu(bn(h @ w4, g4, b4))
    return jax.nn.sigmoid(h @ w5).reshape(-1, 1)


def netd_reference_consistent(x, params):
    """Pure-JAX reference reproducing the kernel arithmetic (bf16 MXU feeds,
    bf16 inter-stage storage, f32 sum/sumsq batch statistics)."""
    (w1, w2, g2, b2, w3, g3, b3, w4, g4, b4, w5) = params
    n = x.shape[0]

    def dot(a, w):
        return jnp.dot(a.astype(jnp.bfloat16), w.astype(jnp.bfloat16),
                       preferred_element_type=jnp.float32)

    def bn_leaky(h_f32, g, b):
        s = jnp.sum(h_f32, axis=0, keepdims=True)
        q = jnp.sum(h_f32 * h_f32, axis=0, keepdims=True)
        scale, shift = _bn_fold(s, q, g, b, n)
        h_stored = h_f32.astype(jnp.bfloat16).astype(jnp.float32)  # bf16 round-trip
        return _leaky_relu(h_stored * scale + shift)

    a1 = _leaky_relu(dot(x, w1))
    h2 = dot(a1, w2)
    a2 = bn_leaky(h2, g2, b2)
    h3 = dot(a2, w3)
    a3 = bn_leaky(h3, g3, b3)
    h4 = dot(a3, w4)
    a4 = bn_leaky(h4, g4, b4)
    return _sigmoid(dot(a4, w5)).reshape(-1, 1)


# --------------------------- self test --------------------------------------

if __name__ == "__main__":
    nc, ndf, batch = 16, 32, 8
    key = jax.random.PRNGKey(0)
    kx, kp, kx2 = jax.random.split(key, 3)
    params = init_params(kp, nc, ndf)

    fwd = jax.jit(netd_forward, static_argnames=("tile_n",))

    # small single-tile case
    x = jax.random.normal(kx, (batch, nc), jnp.float32)
    out = jax.block_until_ready(fwd(x, params))
    assert out.shape == (batch, 1), out.shape
    ref_c = netd_reference_consistent(x, params)
    ref_f = netd_reference_f32(x, params)
    assert jnp.allclose(out, ref_c, atol=5e-3, rtol=5e-3), \
        float(jnp.max(jnp.abs(out - ref_c)))
    assert jnp.allclose(out, ref_f, atol=5e-2, rtol=5e-2), \
        float(jnp.max(jnp.abs(out - ref_f)))

    # multi-tile case: exercises batch padding, row masking and the per-tile
    # BatchNorm-statistics path (partial sums reduced in plain JAX).
    x2 = jax.random.normal(kx2, (72, nc), jnp.float32)
    out2 = jax.block_until_ready(fwd(x2, params, tile_n=32))
    assert out2.shape == (72, 1), out2.shape
    ref2_c = netd_reference_consistent(x2, params)
    ref2_f = netd_reference_f32(x2, params)
    assert jnp.allclose(out2, ref2_c, atol=5e-3, rtol=5e-3), \
        float(jnp.max(jnp.abs(out2 - ref2_c)))
    assert jnp.allclose(out2, ref2_f, atol=5e-2, rtol=5e-2), \
        float(jnp.max(jnp.abs(out2 - ref2_f)))

    print("KERNEL_OK")
</pallas_src>

<mosaic_0001>
module attributes {stable_mosaic.version = 11 : i64} {
  func.func @_first_stage_kernel(%arg0: i32, %arg1: memref<16x16xbf16, #tpu.memory_space<vmem>>, %arg2: memref<16x32xbf16, #tpu.memory_space<vmem>>, %arg3: memref<32x64xbf16, #tpu.memory_space<vmem>>, %arg4: memref<16x64xbf16, #tpu.memory_space<vmem>>, %arg5: memref<1x64xf32, #tpu.memory_space<vmem>>, %arg6: memref<1x64xf32, #tpu.memory_space<vmem>>) attributes {dimension_semantics = [#tpu.dimension_semantics<parallel>], iteration_bounds = array<i64: 1>, scalar_prefetch = 0 : i64, scratch_operands = 0 : i64, tpu.core_type = #tpu.core_type<tc>, window_params = [{transform_indices = @transform_0, window_bounds = array<i64: 16, 16>}, {pipeline_mode = #tpu.pipeline_mode<synchronous>, transform_indices = @transform_1, window_bounds = array<i64: 16, 32>}, {pipeline_mode = #tpu.pipeline_mode<synchronous>, transform_indices = @transform_2, window_bounds = array<i64: 32, 64>}, {transform_indices = @transform_3, window_bounds = array<i64: 16, 64>}, {transform_indices = @transform_4, window_bounds = array<i64: 1, 64>}, {transform_indices = @transform_5, window_bounds = array<i64: 1, 64>}]} {
    %c0 = arith.constant 0 : index
    %c0_0 = arith.constant 0 : index
    %0 = vector.load %arg1[%c0, %c0_0] : memref<16x16xbf16, #tpu.memory_space<vmem>>, vector<16x16xbf16>
    %c0_1 = arith.constant 0 : index
    %c0_2 = arith.constant 0 : index
    %1 = vector.load %arg2[%c0_1, %c0_2] : memref<16x32xbf16, #tpu.memory_space<vmem>>, vector<16x32xbf16>
    %cst = arith.constant dense<0.000000e+00> : vector<16x32xf32>
    %2 = tpu.matmul %0, %1, %cst {dimension_numbers = #tpu.dot_dimension_numbers<[1], [0], [0], [1], [0, 0, 1, 1], [], []>} : vector<16x16xbf16>, vector<16x32xbf16>, vector<16x32xf32> -> vector<16x32xf32>
    %cst_3 = arith.constant 0.000000e+00 : f32
    %3 = vector.broadcast %cst_3 : f32 to vector<16x32xf32>
    %4 = arith.cmpf ogt, %2, %3 : vector<16x32xf32>
    %cst_4 = arith.constant 2.000000e-01 : f32
    %5 = vector.broadcast %cst_4 : f32 to vector<16x32xf32>
    %6 = arith.mulf %5, %2 : vector<16x32xf32>
    %7 = arith.select %4, %2, %6 : vector<16x32xi1>, vector<16x32xf32>
    %8 = arith.truncf %7 : vector<16x32xf32> to vector<16x32xbf16>
    %c0_5 = arith.constant 0 : index
    %c0_6 = arith.constant 0 : index
    %9 = vector.load %arg3[%c0_5, %c0_6] : memref<32x64xbf16, #tpu.memory_space<vmem>>, vector<32x64xbf16>
    %cst_7 = arith.constant dense<0.000000e+00> : vector<16x64xf32>
    %10 = tpu.matmul %8, %9, %cst_7 {dimension_numbers = #tpu.dot_dimension_numbers<[1], [0], [0], [1], [0, 0, 1, 1], [], []>} : vector<16x32xbf16>, vector<32x64xbf16>, vector<16x64xf32> -> vector<16x64xf32>
    %11 = arith.truncf %10 : vector<16x64xf32> to vector<16x64xbf16>
    %c0_8 = arith.constant 0 : index
    %c0_9 = arith.constant 0 : index
    %12 = vector.load %arg4[%c0_8, %c0_9] : memref<16x64xbf16, #tpu.memory_space<vmem>>, vector<16x64xbf16>
    tpu.vector_store %arg4[%c0_8, %c0_9], %11 {strides = array<i32>} : memref<16x64xbf16, #tpu.memory_space<vmem>>, vector<16x64xbf16>,
    %cst_10 = arith.constant dense<0.000000e+00> : vector<64xf32>
    %13 = vector.multi_reduction <add>, %10, %cst_10 [0] : vector<16x64xf32> to vector<64xf32>
    %14 = vector.shape_cast %13 : vector<64xf32> to vector<1x64xf32>
    %c0_11 = arith.constant 0 : index
    %c0_12 = arith.constant 0 : index
    %15 = vector.load %arg5[%c0_11, %c0_12] : memref<1x64xf32, #tpu.memory_space<vmem>>, vector<1x64xf32>
    tpu.vector_store %arg5[%c0_11, %c0_12], %14 {strides = array<i32>} : memref<1x64xf32, #tpu.memory_space<vmem>>, vector<1x64xf32>,
    %16 = arith.mulf %10, %10 : vector<16x64xf32>
    %cst_13 = arith.constant dense<0.000000e+00> : vector<64xf32>
    %17 = vector.multi_reduction <add>, %16, %cst_13 [0] : vector<16x64xf32> to vector<64xf32>
    %18 = vector.shape_cast %17 : vector<64xf32> to vector<1x64xf32>
    %c0_14 = arith.constant 0 : index
    %c0_15 = arith.constant 0 : index
    %19 = vector.load %arg6[%c0_14, %c0_15] : memref<1x64xf32, #tpu.memory_space<vmem>>, vector<1x64xf32>
    tpu.vector_store %arg6[%c0_14, %c0_15], %18 {strides = array<i32>} : memref<1x64xf32, #tpu.memory_space<vmem>>, vector<1x64xf32>,
    return
  }
  func.func @transform_0(%arg0: i32) -> (i32, i32) {
    %c0_i32 = arith.constant 0 : i32
    %c0_i32_0 = arith.constant 0 : i32
    return %arg0, %c0_i32 : i32, i32
  }
  func.func @transform_1(%arg0: i32) -> (i32, i32) {
    %c0_i32 = arith.constant 0 : i32
    %c0_i32_0 = arith.constant 0 : i32
    %c0_i32_1 = arith.constant 0 : i32
    return %c0_i32, %c0_i32_0 : i32, i32
  }
  func.func @transform_2(%arg0: i32) -> (i32, i32) {
    %c0_i32 = arith.constant 0 : i32
    %c0_i32_0 = arith.constant 0 : i32
    %c0_i32_1 = arith.constant 0 : i32
    return %c0_i32, %c0_i32_0 : i32, i32
  }
  func.func @transform_3(%arg0: i32) -> (i32, i32) {
    %c0_i32 = arith.constant 0 : i32
    %c0_i32_0 = arith.constant 0 : i32
    return %arg0, %c0_i32 : i32, i32
  }
  func.func @transform_4(%arg0: i32) -> (i32, i32) {
    %c0_i32 = arith.constant 0 : i32
    %c0_i32_0 = arith.constant 0 : i32
    return %arg0, %c0_i32 : i32, i32
  }
  func.func @transform_5(%arg0: i32) -> (i32, i32) {
    %c0_i32 = arith.constant 0 : i32
    %c0_i32_0 = arith.constant 0 : i32
    return %arg0, %c0_i32 : i32, i32
  }
}

module attributes {stable_mosaic.version = 11 : i64} {
  func.func @_mid_stage_kernel(%arg0: i32, %arg1: memref<16x64xbf16, #tpu.memory_space<vmem>>, %arg2: memref<1x64xf32, #tpu.memory_space<vmem>>, %arg3: memref<1x64xf32, #tpu.memory_space<vmem>>, %arg4: memref<64x128xbf16, #tpu.memory_space<vmem>>, %arg5: memref<16x128xbf16, #tpu.memory_space<vmem>>, %arg6: memref<1x128xf32, #tpu.memory_space<vmem>>, %arg7: memref<1x128xf32, #tpu.memory_space<vmem>>) attributes {dimension_semantics = [#tpu.dimension_semantics<parallel>], iteration_bounds = array<i64: 1>, scalar_prefetch = 0 : i64, scratch_operands = 0 : i64, tpu.core_type = #tpu.core_type<tc>, window_params = [{transform_indices = @transform_0, window_bounds = array<i64: 16, 64>}, {pipeline_mode = #tpu.pipeline_mode<synchronous>, transform_indices = @transform_1, window_bounds = array<i64: 1, 64>}, {pipeline_mode = #tpu.pipeline_mode<synchronous>, transform_indices = @transform_2, window_bounds = array<i64: 1, 64>}, {pipeline_mode = #tpu.pipeline_mode<synchronous>, transform_indices = @transform_3, window_bounds = array<i64: 64, 128>}, {transform_indices = @transform_4, window_bounds = array<i64: 16, 128>}, {transform_indices = @transform_5, window_bounds = array<i64: 1, 128>}, {transform_indices = @transform_6, window_bounds = array<i64: 1, 128>}]} {
    %c0 = arith.constant 0 : index
    %c0_0 = arith.constant 0 : index
    %0 = vector.load %arg1[%c0, %c0_0] : memref<16x64xbf16, #tpu.memory_space<vmem>>, vector<16x64xbf16>
    %1 = arith.extf %0 : vector<16x64xbf16> to vector<16x64xf32>
    %c0_1 = arith.constant 0 : index
    %c0_2 = arith.constant 0 : index
    %2 = vector.load %arg2[%c0_1, %c0_2] : memref<1x64xf32, #tpu.memory_space<vmem>>, vector<1x64xf32>
    %3 = vector.broadcast %2 : vector<1x64xf32> to vector<16x64xf32>
    %4 = arith.mulf %1, %3 : vector<16x64xf32>
    %c0_3 = arith.constant 0 : index
    %c0_4 = arith.constant 0 : index
    %5 = vector.load %arg3[%c0_3, %c0_4] : memref<1x64xf32, #tpu.memory_space<vmem>>, vector<1x64xf32>
    %6 = vector.broadcast %5 : vector<1x64xf32> to vector<16x64xf32>
    %7 = arith.addf %4, %6 : vector<16x64xf32>
    %cst = arith.constant 0.000000e+00 : f32
    %8 = vector.broadcast %cst : f32 to vector<16x64xf32>
    %9 = arith.cmpf ogt, %7, %8 : vector<16x64xf32>
    %cst_5 = arith.constant 2.000000e-01 : f32
    %10 = vector.broadcast %cst_5 : f32 to vector<16x64xf32>
    %11 = arith.mulf %10, %7 : vector<16x64xf32>
    %12 = arith.select %9, %7, %11 : vector<16x64xi1>, vector<16x64xf32>
    %c16_i32 = arith.constant 16 : i32
    %13 = arith.muli %arg0, %c16_i32 : i32
    %14 = tpu.iota {dimensions = array<i32: 0>} : vector<16x1xi32>
    %15 = vector.broadcast %13 : i32 to vector<16x1xi32>
    %16 = arith.addi %15, %14 : vector<16x1xi32>
    %c8_i32 = arith.constant 8 : i32
    %17 = vector.broadcast %c8_i32 : i32 to vector<16x1xi32>
    %18 = arith.cmpi slt, %16, %17 : vector<16x1xi32>
    %cst_6 = arith.constant 0.000000e+00 : f32
    %19 = vector.shape_cast %18 : vector<16x1xi1> to vector<16x1xi1>
    %20 = vector.broadcast %19 : vector<16x1xi1> to vector<16x64xi1>
    %21 = vector.broadcast %cst_6 : f32 to vector<16x64xf32>
    %22 = arith.select %20, %12, %21 : vector<16x64xi1>, vector<16x64xf32>
    %23 = arith.truncf %22 : vector<16x64xf32> to vector<16x64xbf16>
    %c0_7 = arith.constant 0 : index
    %c0_8 = arith.constant 0 : index
    %24 = vector.load %arg4[%c0_7, %c0_8] : memref<64x128xbf16, #tpu.memory_space<vmem>>, vector<64x128xbf16>
    %cst_9 = arith.constant dense<0.000000e+00> : vector<16x128xf32>
    %25 = tpu.matmul %23, %24, %cst_9 {dimension_numbers = #tpu.dot_dimension_numbers<[1], [0], [0], [1], [0, 0, 1, 1], [], []>} : vector<16x64xbf16>, vector<64x128xbf16>, vector<16x128xf32> -> vector<16x128xf32>
    %26 = arith.truncf %25 : vector<16x128xf32> to vector<16x128xbf16>
    %c0_10 = arith.constant 0 : index
    %c0_11 = arith.constant 0 : index
    %27 = vector.load %arg5[%c0_10, %c0_11] : memref<16x128xbf16, #tpu.memory_space<vmem>>, vector<16x128xbf16>
    tpu.vector_store %arg5[%c0_10, %c0_11], %26 {strides = array<i32>} : memref<16x128xbf16, #tpu.memory_space<vmem>>, vector<16x128xbf16>,
    %cst_12 = arith.constant dense<0.000000e+00> : vector<128xf32>
    %28 = vector.multi_reduction <add>, %25, %cst_12 [0] : vector<16x128xf32> to vector<128xf32>
    %29 = vector.shape_cast %28 : vector<128xf32> to vector<1x128xf32>
    %c0_13 = arith.constant 0 : index
    %c0_14 = arith.constant 0 : index
    %30 = vector.load %arg6[%c0_13, %c0_14] : memref<1x128xf32, #tpu.memory_space<vmem>>, vector<1x128xf32>
    tpu.vector_store %arg6[%c0_13, %c0_14], %29 {strides = array<i32>} : memref<1x128xf32, #tpu.memory_space<vmem>>, vector<1x128xf32>,
    %31 = arith.mulf %25, %25 : vector<16x128xf32>
    %cst_15 = arith.constant dense<0.000000e+00> : vector<128xf32>
    %32 = vector.multi_reduction <add>, %31, %cst_15 [0] : vector<16x128xf32> to vector<128xf32>
    %33 = vector.shape_cast %32 : vector<128xf32> to vector<1x128xf32>
    %c0_16 = arith.constant 0 : index
    %c0_17 = arith.constant 0 : index
    %34 = vector.load %arg7[%c0_16, %c0_17] : memref<1x128xf32, #tpu.memory_space<vmem>>, vector<1x128xf32>
    tpu.vector_store %arg7[%c0_16, %c0_17], %33 {strides = array<i32>} : memref<1x128xf32, #tpu.memory_space<vmem>>, vector<1x128xf32>,
    return
  }
  func.func @transform_0(%arg0: i32) -> (i32, i32) {
    %c0_i32 = arith.constant 0 : i32
    %c0_i32_0 = arith.constant 0 : i32
    return %arg0, %c0_i32 : i32, i32
  }
  func.func @transform_1(%arg0: i32) -> (i32, i32) {
    %c0_i32 = arith.constant 0 : i32
    %c0_i32_0 = arith.constant 0 : i32
    %c0_i32_1 = arith.constant 0 : i32
    return %c0_i32, %c0_i32_0 : i32, i32
  }
  func.func @transform_2(%arg0: i32) -> (i32, i32) {
    %c0_i32 = arith.constant 0 : i32
    %c0_i32_0 = arith.constant 0 : i32
    %c0_i32_1 = arith.constant 0 : i32
    return %c0_i32, %c0_i32_0 : i32, i32
  }
  func.func @transform_3(%arg0: i32) -> (i32, i32) {
    %c0_i32 = arith.constant 0 : i32
    %c0_i32_0 = arith.constant 0 : i32
    %c0_i32_1 = arith.constant 0 : i32
    return %c0_i32, %c0_i32_0 : i32, i32
  }
  func.func @transform_4(%arg0: i32) -> (i32, i32) {
    %c0_i32 = arith.constant 0 : i32
    %c0_i32_0 = arith.constant 0 : i32
    return %arg0, %c0_i32 : i32, i32
  }
  func.func @transform_5(%arg0: i32) -> (i32, i32) {
    %c0_i32 = arith.constant 0 : i32
    %c0_i32_0 = arith.constant 0 : i32
    return %arg0, %c0_i32 : i32, i32
  }
  func.func @transform_6(%arg0: i32) -> (i32, i32) {
    %c0_i32 = arith.constant 0 : i32
    %c0_i32_0 = arith.constant 0 : i32
    return %arg0, %c0_i32 : i32, i32
  }
}

module attributes {stable_mosaic.version = 11 : i64} {
  func.func @_mid_stage_kernel(%arg0: i32, %arg1: memref<16x128xbf16, #tpu.memory_space<vmem>>, %arg2: memref<1x128xf32, #tpu.memory_space<vmem>>, %arg3: memref<1x128xf32, #tpu.memory_space<vmem>>, %arg4: memref<128x256xbf16, #tpu.memory_space<vmem>>, %arg5: memref<16x256xbf16, #tpu.memory_space<vmem>>, %arg6: memref<1x256xf32, #tpu.memory_space<vmem>>, %arg7: memref<1x256xf32, #tpu.memory_space<vmem>>) attributes {dimension_semantics = [#tpu.dimension_semantics<parallel>], iteration_bounds = array<i64: 1>, scalar_prefetch = 0 : i64, scratch_operands = 0 : i64, tpu.core_type = #tpu.core_type<tc>, window_params = [{transform_indices = @transform_0, window_bounds = array<i64: 16, 128>}, {pipeline_mode = #tpu.pipeline_mode<synchronous>, transform_indices = @transform_1, window_bounds = array<i64: 1, 128>}, {pipeline_mode = #tpu.pipeline_mode<synchronous>, transform_indices = @transform_2, window_bounds = array<i64: 1, 128>}, {pipeline_mode = #tpu.pipeline_mode<synchronous>, transform_indices = @transform_3, window_bounds = array<i64: 128, 256>}, {transform_indices = @transform_4, window_bounds = array<i64: 16, 256>}, {transform_indices = @transform_5, window_bounds = array<i64: 1, 256>}, {transform_indices = @transform_6, window_bounds = array<i64: 1, 256>}]} {
    %c0 = arith.constant 0 : index
    %c0_0 = arith.constant 0 : index
    %0 = vector.load %arg1[%c0, %c0_0] : memref<16x128xbf16, #tpu.memory_space<vmem>>, vector<16x128xbf16>
    %1 = arith.extf %0 : vector<16x128xbf16> to vector<16x128xf32>
    %c0_1 = arith.constant 0 : index
    %c0_2 = arith.constant 0 : index
    %2 = vector.load %arg2[%c0_1, %c0_2] : memref<1x128xf32, #tpu.memory_space<vmem>>, vector<1x128xf32>
    %3 = vector.broadcast %2 : vector<1x128xf32> to vector<16x128xf32>
    %4 = arith.mulf %1, %3 : vector<16x128xf32>
    %c0_3 = arith.constant 0 : index
    %c0_4 = arith.constant 0 : index
    %5 = vector.load %arg3[%c0_3, %c0_4] : memref<1x128xf32, #tpu.memory_space<vmem>>, vector<1x128xf32>
    %6 = vector.broadcast %5 : vector<1x128xf32> to vector<16x128xf32>
    %7 = arith.addf %4, %6 : vector<16x128xf32>
    %cst = arith.constant 0.000000e+00 : f32
    %8 = vector.broadcast %cst : f32 to vector<16x128xf32>
    %9 = arith.cmpf ogt, %7, %8 : vector<16x128xf32>
    %cst_5 = arith.constant 2.000000e-01 : f32
    %10 = vector.broadcast %cst_5 : f32 to vector<16x128xf32>
    %11 = arith.mulf %10, %7 : vector<16x128xf32>
    %12 = arith.select %9, %7, %11 : vector<16x128xi1>, vector<16x128xf32>
    %c16_i32 = arith.constant 16 : i32
    %13 = arith.muli %arg0, %c16_i32 : i32
    %14 = tpu.iota {dimensions = array<i32: 0>} : vector<16x1xi32>
    %15 = vector.broadcast %13 : i32 to vector<16x1xi32>
    %16 = arith.addi %15, %14 : vector<16x1xi32>
    %c8_i32 = arith.constant 8 : i32
    %17 = vector.broadcast %c8_i32 : i32 to vector<16x1xi32>
    %18 = arith.cmpi slt, %16, %17 : vector<16x1xi32>
    %cst_6 = arith.constant 0.000000e+00 : f32
    %19 = vector.shape_cast %18 : vector<16x1xi1> to vector<16x1xi1>
    %20 = vector.broadcast %19 : vector<16x1xi1> to vector<16x128xi1>
    %21 = vector.broadcast %cst_6 : f32 to vector<16x128xf32>
    %22 = arith.select %20, %12, %21 : vector<16x128xi1>, vector<16x128xf32>
    %23 = arith.truncf %22 : vector<16x128xf32> to vector<16x128xbf16>
    %c0_7 = arith.constant 0 : index
    %c0_8 = arith.constant 0 : index
    %24 = vector.load %arg4[%c0_7, %c0_8] : memref<128x256xbf16, #tpu.memory_space<vmem>>, vector<128x256xbf16>
    %cst_9 = arith.constant dense<0.000000e+00> : vector<16x256xf32>
    %25 = tpu.matmul %23, %24, %cst_9 {dimension_numbers = #tpu.dot_dimension_numbers<[1], [0], [0], [1], [0, 0, 1, 1], [], []>} : vector<16x128xbf16>, vector<128x256xbf16>, vector<16x256xf32> -> vector<16x256xf32>
    %26 = arith.truncf %25 : vector<16x256xf32> to vector<16x256xbf16>
    %c0_10 = arith.constant 0 : index
    %c0_11 = arith.constant 0 : index
    %27 = vector.load %arg5[%c0_10, %c0_11] : memref<16x256xbf16, #tpu.memory_space<vmem>>, vector<16x256xbf16>
    tpu.vector_store %arg5[%c0_10, %c0_11], %26 {strides = array<i32>} : memref<16x256xbf16, #tpu.memory_space<vmem>>, vector<16x256xbf16>,
    %cst_12 = arith.constant dense<0.000000e+00> : vector<256xf32>
    %28 = vector.multi_reduction <add>, %25, %cst_12 [0] : vector<16x256xf32> to vector<256xf32>
    %29 = vector.shape_cast %28 : vector<256xf32> to vector<1x256xf32>
    %c0_13 = arith.constant 0 : index
    %c0_14 = arith.constant 0 : index
    %30 = vector.load %arg6[%c0_13, %c0_14] : memref<1x256xf32, #tpu.memory_space<vmem>>, vector<1x256xf32>
    tpu.vector_store %arg6[%c0_13, %c0_14], %29 {strides = array<i32>} : memref<1x256xf32, #tpu.memory_space<vmem>>, vector<1x256xf32>,
    %31 = arith.mulf %25, %25 : vector<16x256xf32>
    %cst_15 = arith.constant dense<0.000000e+00> : vector<256xf32>
    %32 = vector.multi_reduction <add>, %31, %cst_15 [0] : vector<16x256xf32> to vector<256xf32>
    %33 = vector.shape_cast %32 : vector<256xf32> to vector<1x256xf32>
    %c0_16 = arith.constant 0 : index
    %c0_17 = arith.constant 0 : index
    %34 = vector.load %arg7[%c0_16, %c0_17] : memref<1x256xf32, #tpu.memory_space<vmem>>, vector<1x256xf32>
    tpu.vector_store %arg7[%c0_16, %c0_17], %33 {strides = array<i32>} : memref<1x256xf32, #tpu.memory_space<vmem>>, vector<1x256xf32>,
    return
  }
  func.func @transform_0(%arg0: i32) -> (i32, i32) {
    %c0_i32 = arith.constant 0 : i32
    %c0_i32_0 = arith.constant 0 : i32
    return %arg0, %c0_i32 : i32, i32
  }
  func.func @transform_1(%arg0: i32) -> (i32, i32) {
    %c0_i32 = arith.constant 0 : i32
    %c0_i32_0 = arith.constant 0 : i32
    %c0_i32_1 = arith.constant 0 : i32
    return %c0_i32, %c0_i32_0 : i32, i32
  }
  func.func @transform_2(%arg0: i32) -> (i32, i32) {
    %c0_i32 = arith.constant 0 : i32
    %c0_i32_0 = arith.constant 0 : i32
    %c0_i32_1 = arith.constant 0 : i32
    return %c0_i32, %c0_i32_0 : i32, i32
  }
  func.func @transform_3(%arg0: i32) -> (i32, i32) {
    %c0_i32 = arith.constant 0 : i32
    %c0_i32_0 = arith.constant 0 : i32
    %c0_i32_1 = arith.constant 0 : i32
    return %c0_i32, %c0_i32_0 : i32, i32
  }
  func.func @transform_4(%arg0: i32) -> (i32, i32) {
    %c0_i32 = arith.constant 0 : i32
    %c0_i32_0 = arith.constant 0 : i32
    return %arg0, %c0_i32 : i32, i32
  }
  func.func @transform_5(%arg0: i32) -> (i32, i32) {
    %c0_i32 = arith.constant 0 : i32
    %c0_i32_0 = arith.constant 0 : i32
    return %arg0, %c0_i32 : i32, i32
  }
  func.func @transform_6(%arg0: i32) -> (i32, i32) {
    %c0_i32 = arith.constant 0 : i32
    %c0_i32_0 = arith.constant 0 : i32
    return %arg0, %c0_i32 : i32, i32
  }
}

module attributes {stable_mosaic.version = 11 : i64} {
  func.func @_last_stage_kernel(%arg0: i32, %arg1: memref<16x256xbf16, #tpu.memory_space<vmem>>, %arg2: memref<1x256xf32, #tpu.memory_space<vmem>>, %arg3: memref<1x256xf32, #tpu.memory_space<vmem>>, %arg4: memref<1x256xbf16, #tpu.memory_space<vmem>>, %arg5: memref<1x16xf32, #tpu.memory_space<vmem>>) attributes {dimension_semantics = [#tpu.dimension_semantics<parallel>], iteration_bounds = array<i64: 1>, scalar_prefetch = 0 : i64, scratch_operands = 0 : i64, tpu.core_type = #tpu.core_type<tc>, window_params = [{transform_indices = @transform_0, window_bounds = array<i64: 16, 256>}, {pipeline_mode = #tpu.pipeline_mode<synchronous>, transform_indices = @transform_1, window_bounds = array<i64: 1, 256>}, {pipeline_mode = #tpu.pipeline_mode<synchronous>, transform_indices = @transform_2, window_bounds = array<i64: 1, 256>}, {pipeline_mode = #tpu.pipeline_mode<synchronous>, transform_indices = @transform_3, window_bounds = array<i64: 1, 256>}, {transform_indices = @transform_4, window_bounds = array<i64: 1, 16>}]} {
    %c0 = arith.constant 0 : index
    %c0_0 = arith.constant 0 : index
    %0 = vector.load %arg1[%c0, %c0_0] : memref<16x256xbf16, #tpu.memory_space<vmem>>, vector<16x256xbf16>
    %1 = arith.extf %0 : vector<16x256xbf16> to vector<16x256xf32>
    %c0_1 = arith.constant 0 : index
    %c0_2 = arith.constant 0 : index
    %2 = vector.load %arg2[%c0_1, %c0_2] : memref<1x256xf32, #tpu.memory_space<vmem>>, vector<1x256xf32>
    %3 = vector.broadcast %2 : vector<1x256xf32> to vector<16x256xf32>
    %4 = arith.mulf %1, %3 : vector<16x256xf32>
    %c0_3 = arith.constant 0 : index
    %c0_4 = arith.constant 0 : index
    %5 = vector.load %arg3[%c0_3, %c0_4] : memref<1x256xf32, #tpu.memory_space<vmem>>, vector<1x256xf32>
    %6 = vector.broadcast %5 : vector<1x256xf32> to vector<16x256xf32>
    %7 = arith.addf %4, %6 : vector<16x256xf32>
    %cst = arith.constant 0.000000e+00 : f32
    %8 = vector.broadcast %cst : f32 to vector<16x256xf32>
    %9 = arith.cmpf ogt, %7, %8 : vector<16x256xf32>
    %cst_5 = arith.constant 2.000000e-01 : f32
    %10 = vector.broadcast %cst_5 : f32 to vector<16x256xf32>
    %11 = arith.mulf %10, %7 : vector<16x256xf32>
    %12 = arith.select %9, %7, %11 : vector<16x256xi1>, vector<16x256xf32>
    %c0_6 = arith.constant 0 : index
    %c0_7 = arith.constant 0 : index
    %13 = vector.load %arg4[%c0_6, %c0_7] : memref<1x256xbf16, #tpu.memory_space<vmem>>, vector<1x256xbf16>
    %14 = arith.truncf %12 : vector<16x256xf32> to vector<16x256xbf16>
    %cst_8 = arith.constant dense<0.000000e+00> : vector<1x16xf32>
    %15 = tpu.matmul %13, %14, %cst_8 {dimension_numbers = #tpu.dot_dimension_numbers<[1], [1], [0], [0], [0, 0, 1, 0], [], []>} : vector<1x256xbf16>, vector<16x256xbf16>, vector<1x16xf32> -> vector<1x16xf32>
    %cst_9 = arith.constant 5.000000e-01 : f32
    %16 = vector.broadcast %cst_9 : f32 to vector<1x16xf32>
    %17 = arith.mulf %16, %15 : vector<1x16xf32>
    %18 = math.tanh %17 : vector<1x16xf32>
    %cst_10 = arith.constant 1.000000e+00 : f32
    %19 = vector.broadcast %cst_10 : f32 to vector<1x16xf32>
    %20 = arith.addf %18, %19 : vector<1x16xf32>
    %cst_11 = arith.constant 5.000000e-01 : f32
    %21 = vector.broadcast %cst_11 : f32 to vector<1x16xf32>
    %22 = arith.mulf %21, %20 : vector<1x16xf32>
    %c0_12 = arith.constant 0 : index
    %c0_13 = arith.constant 0 : index
    %23 = vector.load %arg5[%c0_12, %c0_13] : memref<1x16xf32, #tpu.memory_space<vmem>>, vector<1x16xf32>
    tpu.vector_store %arg5[%c0_12, %c0_13], %22 {strides = array<i32>} : memref<1x16xf32, #tpu.memory_space<vmem>>, vector<1x16xf32>,
    return
  }
  func.func @transform_0(%arg0: i32) -> (i32, i32) {
    %c0_i32 = arith.constant 0 : i32
    %c0_i32_0 = arith.constant 0 : i32
    return %arg0, %c0_i32 : i32, i32
  }
  func.func @transform_1(%arg0: i32) -> (i32, i32) {
    %c0_i32 = arith.constant 0 : i32
    %c0_i32_0 = arith.constant 0 : i32
    %c0_i32_1 = arith.constant 0 : i32
    return %c0_i32, %c0_i32_0 : i32, i32
  }
  func.func @transform_2(%arg0: i32) -> (i32, i32) {
    %c0_i32 = arith.constant 0 : i32
    %c0_i32_0 = arith.constant 0 : i32
    %c0_i32_1 = arith.constant 0 : i32
    return %c0_i32, %c0_i32_0 : i32, i32
  }
  func.func @transform_3(%arg0: i32) -> (i32, i32) {
    %c0_i32 = arith.constant 0 : i32
    %c0_i32_0 = arith.constant 0 : i32
    %c0_i32_1 = arith.constant 0 : i32
    return %c0_i32, %c0_i32_0 : i32, i32
  }
  func.func @transform_4(%arg0: i32) -> (i32, i32) {
    %c0_i32 = arith.constant 0 : i32
    %c0_i32_0 = arith.constant 0 : i32
    return %arg0, %c0_i32 : i32, i32
  }
}

</mosaic_0001>

<bundles_post_ra>
// kernel: netd_forward.6
= control target key start
LH: loop header
LB: loop body
LE: loop exit
PB: predicated region body
PF: predicated region fallthrough
CT: control target
= control target key end

     0   :  { %v353_v1 = vmov 0   ;;  %v354_v25 = vmov 0.0   ;;  %v355_v46 = vmov 1966171168   ;;  %v238_v48 = vlaneseq  ;;  %s460_s3 = inlined_call_operand.vmem [shape: bf16[128,256], index: 3, kind: input, shape index: {}]   ;;  %s461_s0 = inlined_call_operand.vmem [shape: bf16[16,128], index: 0, kind: input, shape index: {}]   ;;  %s462_s1 = inlined_call_operand.vmem [shape: f32[1,128], index: 1, kind: input, shape index: {}]   ;;  %s463_s2 = inlined_call_operand.vmem [shape: f32[1,128], index: 2, kind: input, shape index: {}]   ;;  %s464_s4 = inlined_call_operand.vmem [shape: bf16[16,256], index: 4, kind: output, shape index: {0}]   ;;  %s465_s5 = inlined_call_operand.vmem [shape: f32[1,256], index: 5, kind: output, shape index: {1}]   ;;  %s466_s6 = inlined_call_operand.vmem [shape: f32[1,256], index: 6, kind: output, shape index: {2}]  }
   0x1   :  { %v329_v0 = vld [vmem:[%s460_s3 + $0x4] ss:$8 sps:$4 sm:$0xff]   ;;  %193 = vmatprep.mubr.bf16.mxu0 %v353_v1  ;;  %v331_v2 = vld [vmem:[%s460_s3] ss:$8 sps:$4 sm:$0xff]   ;;  %v332_v3 = vld [vmem:[%s460_s3 + $0x14] ss:$8 sps:$4 sm:$0xff]   ;;  %v236_v47 = vunpack.c.l.s4 %v355_v46 }
   0x2   :  { %161 = vmatprep.subr.bf16.mxu0 %v329_v0  ;;  %v334_v4 = vld [vmem:[%s460_s3 + $0x10] ss:$8 sps:$4 sm:$0xff]   ;;  %v335_v5 = vld [vmem:[%s460_s3 + $0x24] ss:$8 sps:$4 sm:$0xff]   ;;  %v337_v6 = vld [vmem:[%s460_s3 + $0x20] ss:$8 sps:$4 sm:$0xff]  }
   0x3   :  { %162 = vmatpush1.bf16.msra.mxu0 %v331_v2  ;;  %v338_v7 = vld [vmem:[%s460_s3 + $0x34] ss:$8 sps:$4 sm:$0xff]   ;;  %v21_v8 = vld [vmem:[%s461_s0] sm:$0xf]  ;;  %v340_v9 = vld [vmem:[%s460_s3 + $0x30] ss:$8 sps:$4 sm:$0xff]   ;;  %v237_v57 = vunpack.c.0.s8 %v236_v47 }
   0x4   :  { %163 = vmatprep.subr.bf16.mxu0 %v332_v3  ;;  %v23_v10 = vunpack.c.l.bf16 %v21_v8  ;;  %v341_v11 = vld [vmem:[%s460_s3 + $0x44] ss:$8 sps:$4 sm:$0xff]   ;;  %v304_v12 = vld [vmem:[%s462_s1] ss:$0 sm:$0xff]  ;;  %v344_v15 = vld [vmem:[%s460_s3 + $0x54] ss:$8 sps:$4 sm:$0xff]  }
   0x5   :  { %v343_v13 = vld [vmem:[%s460_s3 + $0x40] ss:$8 sps:$4 sm:$0xff]   ;;  %v346_v17 = vld [vmem:[%s460_s3 + $0x50] ss:$8 sps:$4 sm:$0xff]   ;;  %v347_v19 = vld [vmem:[%s460_s3 + $0x64] ss:$8 sps:$4 sm:$0xff]  }
   0x6   :  { %v32_v14 = vmul.f32 %v304_v12, %v23_v10  ;;  %v305_v16 = vld [vmem:[%s463_s2] ss:$0 sm:$0xff]  ;;  %v350_v22 = vld [vmem:[%s460_s3 + $0x74] ss:$8 sps:$4 sm:$0xff]   ;;  %v352_v23 = vld [vmem:[%s460_s3 + $0x70] ss:$8 sps:$4 sm:$0xff]  }
   0x7   :  { %164 = vmatpush1.bf16.msra.mxu0 %v334_v4  ;;  %v349_v20 = vld [vmem:[%s460_s3 + $0x60] ss:$8 sps:$4 sm:$0xff]   ;;  %v239_v58 = vshrl.u32 %v238_v48, 7  ;;  %vm252_vm1 = vcmp.lt.s32.totalorder %v238_v48, 256 }
   0x8   :  { %165 = vmatprep.subr.bf16.mxu0 %v335_v5  ;;  %v41_v18 = vadd.f32 %v305_v16, %v32_v14 }
   0x9   :  { %v240_v3 = vsub.s32 %v237_v57, %v239_v58 }
   0xa   :  { %v45_v21 = vmul.f32 0.2, %v41_v18  ;;  %vm43_vm0 = vcmp.gt.f32.partialorder %v41_v18, 0.0 }
   0xb   :  { %166 = vmatpush1.bf16.msra.mxu0 %v337_v6 }
   0xc   :  { %167 = vmatprep.subr.bf16.mxu0 %v338_v7  ;;  %v47_v24 = vsel %vm43_vm0, %v41_v18, %v45_v21 }
   0xd   :  { %v64_v26 = vpack.c.bf16 %v354_v25, %v47_v24 }
   0xf   :  { %168 = vmatpush1.bf16.msra.mxu0 %v340_v9 }
  0x10   :  { %169 = vmatprep.subr.bf16.mxu0 %v341_v11 }
  0x13   :  { %170 = vmatpush1.bf16.msra.mxu0 %v343_v13 }
  0x14   :  { %171 = vmatprep.subr.bf16.mxu0 %v344_v15 }
  0x17   :  { %172 = vmatpush1.bf16.msra.mxu0 %v346_v17 }
  0x18   :  { %173 = vmatprep.subr.bf16.mxu0 %v347_v19 }
  0x1b   :  { %174 = vmatpush1.bf16.msra.mxu0 %v349_v20 }
  0x1c   :  { %175 = vmatprep.subr.bf16.mxu0 %v350_v22 }
  0x1f   :  { %176 = vmatpush1.bf16.msra.mxu0 %v352_v23 }
  0x22   :  { %194 = vmatmul.mubr.bf16.vlgmr.msra.gmra.mrb[0].mxu0 %v64_v26 }
  0xf5   :  { %v195_v27 = vpop.f32.mrb[0].mxu0 }
  0xf6   :  { %v197_v28 = vpop.f32.mrb[1].mxu0  ;;  %v255_v31 = vmul.f32 %v195_v27, %v195_v27 }
  0xf7   :  { %v324_v29 = vpack.c.bf16 %v197_v28, %v195_v27  ;;  %v199_v30 = vpop.f32.mrb[2].mxu0  ;;  %v256_v35 = vmul.f32 %v197_v28, %v197_v28 }
  0xf8   :  { %v218_v32 = vadd.f32 %v199_v30, %v195_v27  ;;  %v257_v33 = vmul.f32 %v199_v30, %v199_v30  ;;  %v201_v34 = vpop.f32.mrb[3].mxu0 }
  0xf9   :  { %v325_v36 = vpack.c.bf16 %v201_v34, %v199_v30  ;;  %216 = vst [vmem:[%s464_s4] sm:$0xff] %v324_v29  ;;  %v225_v37 = vadd.f32 %v201_v34, %v197_v28  ;;  %v258_v38 = vmul.f32 %v201_v34, %v201_v34 }
  0xfa   :  { %v219_v39 = vrot.slane %v218_v32, 4  ;;  %v259_v40 = vadd.f32 %v257_v33, %v255_v31 }
  0xfb   :  { %217 = vst [vmem:[%s464_s4 + $0x8] sm:$0xff] %v325_v36  ;;  %v226_v41 = vrot.slane %v225_v37, 4  ;;  %v266_v42 = vadd.f32 %v258_v38, %v256_v35 }
  0xfc   :  { %v220_v43 = vadd.f32 %v219_v39, %v218_v32  ;;  %v260_v44 = vrot.slane %v259_v40, 4 }
  0xfd   :  { %v227_v45 = vadd.f32 %v226_v41, %v225_v37  ;;  %v267_v49 = vrot.slane %v266_v42, 4 }
  0xfe   :  { %v221_v50 = vrot.slane %v220_v43, 2  ;;  %v261_v51 = vadd.f32 %v260_v44, %v259_v40 }
  0xff   :  { %v228_v52 = vrot.slane %v227_v45, 2  ;;  %v268_v53 = vadd.f32 %v267_v49, %v266_v42 }
 0x100   :  { %v222_v54 = vadd.f32 %v221_v50, %v220_v43  ;;  %v262_v55 = vrot.slane %v261_v51, 2 }
 0x101   :  { %v229_v56 = vadd.f32 %v228_v52, %v227_v45  ;;  %v269_v59 = vrot.slane %v268_v53, 2 }
 0x102   :  { %v223_v60 = vrot.slane %v222_v54, 1  ;;  %v263_v61 = vadd.f32 %v262_v55, %v261_v51 }
 0x103   :  { %v230_v62 = vrot.slane %v229_v56, 1  ;;  %v270_v63 = vadd.f32 %v269_v59, %v268_v53 }
 0x104   :  { %v224_v0 = vadd.f32 %v223_v60, %v222_v54  ;;  %v264_v1 = vrot.slane %v263_v61, 1 }
 0x105   :  { %v231_v2 = vadd.f32 %v230_v62, %v229_v56  ;;  %v271_v4 = vrot.slane %v270_v63, 1 }
 0x106   :  { %v265_v5 = vadd.f32 %v264_v1, %v263_v61 }
 0x107   :  { %v234_v6 = vcombine.low %v224_v0, %v231_v2  ;;  %v272_v7 = vadd.f32 %v271_v4, %v270_v63 }
 0x109   :  { %v241_v8 = vrot.slane %v234_v6, %v240_v3  ;;  %v275_v9 = vcombine.low %v265_v5, %v272_v7 }
 0x10b   :  { %v248_v10 = vrot.slane %v241_v8, %v240_v3  ;;  %v282_v11 = vrot.slane %v275_v9, %v240_v3 }
 0x10d   :  { %254 = vst.msk [vmem:[%s465_s5] sm:$0x3] %vm252_vm1, %v248_v10  ;;  %v289_v12 = vrot.slane %v282_v11, %v240_v3 }
 0x10f   :  { %291 = vst.msk [vmem:[%s466_s6] sm:$0x3] %vm252_vm1, %v289_v12 }

// kernel: netd_forward.4
= control target key start
LH: loop header
LB: loop body
LE: loop exit
PB: predicated region body
PF: predicated region fallthrough
CT: control target
= control target key end

     0   :  { %v228_v0 = vmov 0.0   ;;  %vm229_vm0 = vmmov 0   ;;  %vm33_vm1 = vcmask 130048   ;;  %vm101_vm4 = vcmask 261120   ;;  %s284_s1 = inlined_call_operand.vmem [shape: bf16[16,32], index: 1, kind: input, shape index: {}]   ;;  %s285_s0 = inlined_call_operand.vmem [shape: bf16[16,16], index: 0, kind: input, shape index: {}]   ;;  %s286_s2 = inlined_call_operand.vmem [shape: bf16[32,64], index: 2, kind: input, shape index: {}]   ;;  %s287_s3 = inlined_call_operand.vmem [shape: bf16[16,64], index: 3, kind: output, shape index: {0}]   ;;  %s288_s4 = inlined_call_operand.vmem [shape: f32[1,64], index: 4, kind: output, shape index: {1}]   ;;  %s289_s5 = inlined_call_operand.vmem [shape: f32[1,64], index: 5, kind: output, shape index: {2}]  }
   0x1   :  { %208 = vmatprep.subr.bf16.mxu0 %v228_v0  ;;  %v224_v1 = vld [vmem:[%s284_s1] sm:$0xff]   ;;  %210 = vmatprep.mubr.msk.bf16.mxu0 %vm229_vm0, %v228_v0  ;;  %v227_v4 = vld [vmem:[%s286_s2 + $0x8] sm:$0xff]   ;;  %vm154_vm5 = vcmask 519168   ;;  %vm157_vm6 = vcmask 523264   ;;  %vm167_vm7 = vcmask 516096  }
   0x2   :  { %v225_v2 = vld [vmem:[%s285_s0] sm:$0xff]   ;;  %214 = vmatprep.subr.bf16.mxu1 %v228_v0  ;;  %218 = vmatprep.mubr.msk.bf16.mxu1 %vm229_vm0, %v228_v0 }
   0x3   :  { %209 = vmatpush3.bf16.msra.mxu0 %v224_v1  ;;  %v226_v3 = vld [vmem:[%s286_s2] sm:$0xff]  }
   0x4   :  { %215 = vmatpush3.bf16.msra.mxu1 %v226_v3 }
   0x5   :  { %216 = vmatprep.subr.bf16.mxu1 %v228_v0 }
   0x6   :  { %211 = vmatmul.mubr.msk.bf16.vlgmr.msra.gmra.mrb[0].mxu0 %vm33_vm1, %v225_v2 }
   0x8   :  { %217 = vmatpush3.bf16.msra.mxu1 %v227_v4 }
  0xd9   :  { %v71_v5 = vpop.f32.mrb[0].mxu0 }
  0xda   :  { %v80_v6 = vmul.f32 0.2, %v71_v5  ;;  %v212_v7 = vpop.f32.mrb[1].mxu0  ;;  %vm78_vm2 = vcmp.gt.f32.partialorder %v71_v5, 0.0 }
  0xdb   :  { %v74_v8 = vpop.f32.mrb[2].mxu0 }
  0xdc   :  { %vm79_vm3 = vcmp.gt.f32.partialorder %v74_v8, 0.0  ;;  %v81_v9 = vmul.f32 0.2, %v74_v8  ;;  %v213_v10 = vpop.f32.mrb[3].mxu0  ;;  %v82_v11 = vsel %vm78_vm2, %v71_v5, %v80_v6 }
  0xde   :  { %v83_v12 = vsel %vm79_vm3, %v74_v8, %v81_v9 }
  0xdf   :  { %v84_v13 = vpack.c.bf16 %v83_v12, %v82_v11 }
  0xe1   :  { %219 = vmatmul.mubr.msk.bf16.vlgmr.msra.gmra.mrb[0].mxu1 %vm101_vm4, %v84_v13 }
 0x1b4   :  { %v139_v14 = vpop.f32.mrb[0].mxu1 }
 0x1b5   :  { %v201_v15 = vpack.c.bf16 %v139_v14, %v139_v14  ;;  %v169_v16 = vmul.f32 %v139_v14, %v139_v14  ;;  %v220_v17 = vpop.f32.mrb[1].mxu1  ;;  %v158_v19 = vsel %vm157_vm6, %v139_v14, 0.0 }
 0x1b6   :  { %v142_v18 = vpop.f32.mrb[2].mxu1 }
 0x1b7   :  { %155 = vst.msk [vmem:[%s287_s3] sm:$0xf] %vm154_vm5, %v201_v15  ;;  %v202_v20 = vpack.c.bf16 %v142_v18, %v142_v18  ;;  %v159_v21 = vsel %vm157_vm6, %v142_v18, 0.0  ;;  %v170_v22 = vmul.f32 %v142_v18, %v142_v18  ;;  %v221_v23 = vpop.f32.mrb[3].mxu1  ;;  %v171_v25 = vsel %vm157_vm6, %v169_v16, 0.0 }
 0x1b8   :  { %v160_v24 = vadd.f32 %v159_v21, %v158_v19 }
 0x1b9   :  { %156 = vst.msk [vmem:[%s287_s3 + $0x4] sm:$0xf] %vm154_vm5, %v202_v20  ;;  %v172_v26 = vsel %vm157_vm6, %v170_v22, 0.0 }
 0x1ba   :  { %v161_v27 = vrot.slane %v160_v24, 4  ;;  %v173_v28 = vadd.f32 %v172_v26, %v171_v25 }
 0x1bc   :  { %v162_v29 = vadd.f32 %v161_v27, %v160_v24  ;;  %v174_v30 = vrot.slane %v173_v28, 4 }
 0x1be   :  { %v163_v31 = vrot.slane %v162_v29, 2  ;;  %v175_v32 = vadd.f32 %v174_v30, %v173_v28 }
 0x1c0   :  { %v164_v33 = vadd.f32 %v163_v31, %v162_v29  ;;  %v176_v34 = vrot.slane %v175_v32, 2 }
 0x1c2   :  { %v165_v35 = vrot.slane %v164_v33, 1  ;;  %v177_v36 = vadd.f32 %v176_v34, %v175_v32 }
 0x1c4   :  { %v166_v37 = vadd.f32 %v165_v35, %v164_v33  ;;  %v178_v38 = vrot.slane %v177_v36, 1 }
 0x1c6   :  { %168 = vst.msk [vmem:[%s288_s4] sm:$0x1] %vm167_vm7, %v166_v37  ;;  %v179_v39 = vadd.f32 %v178_v38, %v177_v36 }
 0x1c8   :  { %180 = vst.msk [vmem:[%s289_s5] sm:$0x1] %vm167_vm7, %v179_v39 }

// kernel: netd_forward.5
= control target key start
LH: loop header
LB: loop body
LE: loop exit
PB: predicated region body
PF: predicated region fallthrough
CT: control target
= control target key end

     0   :  { %v221_v0 = vmov 0.0   ;;  %vm222_vm0 = vmmov 0   ;;  %vm97_vm2 = vcmask 523264   ;;  %s288_s3 = inlined_call_operand.vmem [shape: bf16[64,128], index: 3, kind: input, shape index: {}]   ;;  %s289_s0 = inlined_call_operand.vmem [shape: bf16[16,64], index: 0, kind: input, shape index: {}]   ;;  %s290_s1 = inlined_call_operand.vmem [shape: f32[1,64], index: 1, kind: input, shape index: {}]   ;;  %s291_s2 = inlined_call_operand.vmem [shape: f32[1,64], index: 2, kind: input, shape index: {}]   ;;  %s292_s4 = inlined_call_operand.vmem [shape: bf16[16,128], index: 4, kind: output, shape index: {0}]   ;;  %s293_s5 = inlined_call_operand.vmem [shape: f32[1,128], index: 5, kind: output, shape index: {1}]   ;;  %s294_s6 = inlined_call_operand.vmem [shape: f32[1,128], index: 6, kind: output, shape index: {2}]  }
   0x1   :  { %203 = vmatprep.subr.bf16.mxu0 %v221_v0  ;;  %v217_v1 = vld [vmem:[%s288_s3] sm:$0xff]   ;;  %211 = vmatprep.mubr.msk.bf16.mxu0 %vm222_vm0, %v221_v0  ;;  %v218_v2 = vld [vmem:[%s288_s3 + $0x8] sm:$0xff]   ;;  %v219_v6 = vld [vmem:[%s288_s3 + $0x10] sm:$0xff]  }
   0x2   :  { %204 = vmatpush3.bf16.msra.mxu0 %v217_v1  ;;  %v21_v3 = vld [vmem:[%s289_s0] sm:$0xf]  ;;  %v220_v10 = vld [vmem:[%s288_s3 + $0x18] sm:$0xff]  }
   0x3   :  { %205 = vmatprep.subr.bf16.mxu0 %v221_v0  ;;  %v182_v4 = vld [vmem:[%s290_s1] ss:$0 sm:$0xff]  ;;  %v23_v5 = vunpack.c.l.bf16 %v21_v3 }
   0x4   :  { %v183_v7 = vld [vmem:[%s291_s2] ss:$0 sm:$0xff] }
   0x5   :  { %v32_v8 = vmul.f32 %v182_v4, %v23_v5 }
   0x6   :  { %206 = vmatpush3.bf16.msra.mxu0 %v218_v2 }
   0x7   :  { %207 = vmatprep.subr.bf16.mxu0 %v221_v0  ;;  %v41_v9 = vadd.f32 %v183_v7, %v32_v8 }
   0x9   :  { %vm43_vm1 = vcmp.gt.f32.partialorder %v41_v9, 0.0  ;;  %v45_v11 = vmul.f32 0.2, %v41_v9 }
   0xa   :  { %208 = vmatpush3.bf16.msra.mxu0 %v219_v6 }
   0xb   :  { %209 = vmatprep.subr.bf16.mxu0 %v221_v0  ;;  %v47_v12 = vsel %vm43_vm1, %v41_v9, %v45_v11 }
   0xc   :  { %v64_v13 = vpack.c.bf16 %v221_v0, %v47_v12 }
   0xe   :  { %210 = vmatpush3.bf16.msra.mxu0 %v220_v10 }
  0x11   :  { %212 = vmatmul.mubr.msk.bf16.vlgmr.msra.gmra.mrb[0].mxu0 %vm97_vm2, %v64_v13 }
  0xe4   :  { %v135_v14 = vpop.f32.mrb[0].mxu0 }
  0xe5   :  { %v213_v15 = vpop.f32.mrb[1].mxu0  ;;  %v160_v17 = vmul.f32 %v135_v14, %v135_v14 }
  0xe6   :  { %v138_v16 = vpop.f32.mrb[2].mxu0 }
  0xe7   :  { %v196_v18 = vpack.c.bf16 %v138_v16, %v135_v14  ;;  %v152_v19 = vadd.f32 %v138_v16, %v135_v14  ;;  %v161_v20 = vmul.f32 %v138_v16, %v138_v16  ;;  %v214_v21 = vpop.f32.mrb[3].mxu0 }
  0xe9   :  { %197 = vst [vmem:[%s292_s4] sm:$0xff] %v196_v18   ;;  %v153_v22 = vrot.slane %v152_v19, 4  ;;  %v162_v23 = vadd.f32 %v161_v20, %v160_v17 }
  0xeb   :  { %v154_v24 = vadd.f32 %v153_v22, %v152_v19  ;;  %v163_v25 = vrot.slane %v162_v23, 4 }
  0xed   :  { %v155_v26 = vrot.slane %v154_v24, 2  ;;  %v164_v27 = vadd.f32 %v163_v25, %v162_v23 }
  0xef   :  { %v156_v28 = vadd.f32 %v155_v26, %v154_v24  ;;  %v165_v29 = vrot.slane %v164_v27, 2 }
  0xf1   :  { %v157_v30 = vrot.slane %v156_v28, 1  ;;  %v166_v31 = vadd.f32 %v165_v29, %v164_v27 }
  0xf3   :  { %v158_v32 = vadd.f32 %v157_v30, %v156_v28  ;;  %v167_v33 = vrot.slane %v166_v31, 1 }
  0xf5   :  { %159 = vst [vmem:[%s293_s5] sm:$0x1] %v158_v32  ;;  %v168_v34 = vadd.f32 %v167_v33, %v166_v31 }
  0xf7   :  { %169 = vst [vmem:[%s294_s6] sm:$0x1] %v168_v34 }

// kernel: netd_forward.7
= control target key start
LH: loop header
LB: loop body
LE: loop exit
PB: predicated region body
PF: predicated region fallthrough
CT: control target
= control target key end

     0   :  { %v26_v0 = vlaneseq  ;;  %v150_v3 = vmov 1966171168   ;;  %vm140_vm4 = vcmask 122880   ;;  %s194_s0 = inlined_call_operand.vmem [shape: bf16[16,256], index: 0, kind: input, shape index: {}]   ;;  %s195_s1 = inlined_call_operand.vmem [shape: f32[1,256], index: 1, kind: input, shape index: {}]   ;;  %s196_s2 = inlined_call_operand.vmem [shape: f32[1,256], index: 2, kind: input, shape index: {}]   ;;  %s197_s3 = inlined_call_operand.vmem [shape: bf16[1,256], index: 3, kind: input, shape index: {}]   ;;  %s198_s4 = inlined_call_operand.vmem [shape: f32[1,16], index: 4, kind: output, shape index: {}]  }
   0x1   :  { %v18_v1 = vld [vmem:[%s194_s0] sm:$0xff]  ;;  %v19_v2 = vld [vmem:[%s194_s0 + $0x8] sm:$0xff]  ;;  %v81_v4 = vunpack.c.l.s4 %v150_v3 }
   0x2   :  { %v24_v5 = vld [vmem:[%s195_s1] sm:$0x3]  ;;  %v27_v6 = vshrl.u32 %v26_v0, 7  ;;  %v21_v7 = vunpack.c.h.bf16 %v18_v1  ;;  %v23_v8 = vunpack.c.h.bf16 %v19_v2  ;;  %v20_v10 = vunpack.c.l.bf16 %v18_v1 }
   0x3   :  { %v40_v9 = vld [vmem:[%s196_s2] sm:$0x3]  ;;  %v82_v12 = vunpack.c.0.s8 %v81_v4  ;;  %v22_v14 = vunpack.c.l.bf16 %v19_v2 }
   0x4   :  { %v146_v11 = vld.sshfl [vmem:[%s197_s3] sm:$0x11 pattern:$0x75316420]  ;;  %v32_v13 = vsub.s32 1, %v27_v6  ;;  %v28_v15 = vsub.s32 0, %v27_v6 }
   0x5   :  { %v79_v16 = vcombine.high %v146_v11, %v146_v11  ;;  %v85_v17 = vsub.s32 %v82_v12, %v27_v6 }
   0x6   :  { %v33_v18 = vrot.slane %v24_v5, %v32_v13  ;;  %v49_v19 = vrot.slane %v40_v9, %v32_v13  ;;  %v29_v20 = vrot.slane %v24_v5, %v28_v15  ;;  %v45_v21 = vrot.slane %v40_v9, %v28_v15 }
   0x7   :  { %v93_v22 = vrot.slane %v79_v16, %v85_v17  ;;  %v86_v41 = vrot.slane %v146_v11, %v85_v17 }
   0x8   :  { %v37_v23 = vmul.f32 %v33_v18, %v21_v7  ;;  %v39_v24 = vmul.f32 %v33_v18, %v23_v8  ;;  %v36_v25 = vmul.f32 %v29_v20, %v20_v10  ;;  %v38_v26 = vmul.f32 %v29_v20, %v22_v14 }
   0x9   :  { %128 = vmatprep.mubr.bf16.mxu0 %v93_v22 }
   0xa   :  { %v53_v27 = vadd.f32 %v49_v19, %v37_v23  ;;  %v55_v28 = vadd.f32 %v49_v19, %v39_v24  ;;  %v52_v29 = vadd.f32 %v45_v21, %v36_v25  ;;  %v54_v30 = vadd.f32 %v45_v21, %v38_v26 }
   0xc   :  { %vm57_vm0 = vcmp.gt.f32.partialorder %v53_v27, 0.0  ;;  %vm59_vm1 = vcmp.gt.f32.partialorder %v55_v28, 0.0  ;;  %v61_v31 = vmul.f32 0.2, %v53_v27  ;;  %v63_v32 = vmul.f32 0.2, %v55_v28 }
   0xd   :  { %vm56_vm2 = vcmp.gt.f32.partialorder %v52_v29, 0.0  ;;  %vm58_vm3 = vcmp.gt.f32.partialorder %v54_v30, 0.0  ;;  %v60_v33 = vmul.f32 0.2, %v52_v29  ;;  %v62_v34 = vmul.f32 0.2, %v54_v30 }
   0xe   :  { %v65_v35 = vsel %vm57_vm0, %v53_v27, %v61_v31  ;;  %v67_v36 = vsel %vm59_vm1, %v55_v28, %v63_v32 }
   0xf   :  { %v70_v37 = vpack.c.bf16 %v67_v36, %v65_v35  ;;  %v64_v38 = vsel %vm56_vm2, %v52_v29, %v60_v33  ;;  %v66_v39 = vsel %vm58_vm3, %v54_v30, %v62_v34 }
  0x10   :  { %v69_v40 = vpack.c.bf16 %v66_v39, %v64_v38 }
  0x11   :  { %96 = vmatprep.subr.bf16.mxu0 %v70_v37 }
  0x12   :  { %97 = vmatpush1.bf16.xpose.msra.mxu0 %v69_v40 }
  0x19   :  { %129 = vmatmul.mubr.bf16.vlgmr.msra.gmra.mrb[0].mxu0 %v86_v41 }
  0xec   :  { %v130_v42 = vpop.f32.mrb[0].mxu0 }
  0xed   :  { %v136_v43 = vmul.f32 0.5, %v130_v42  ;;  %v132_v44 = vpop.f32.mrb[1].mxu0 }
  0xee   :  { %v133_v45 = vpop.f32.mrb[2].mxu0 }
  0xef   :  { %148 = vtanh.f32 %v136_v43  ;;  %v134_v46 = vpop.f32.mrb[3].mxu0 }
  0xf9   :  { %v149_v47 = vpop.eup %148 }
  0xfa   :  { %v138_v48 = vadd.f32 1.0, %v149_v47 }
  0xfc   :  { %v139_v49 = vmul.f32 0.5, %v138_v48 }
  0xfe   :  { %141 = vst.msk [vmem:[%s198_s4] sm:$0x1] %vm140_vm4, %v139_v49 }

</bundles_post_ra>
